<compile_context>
chip_gen: v7x
topology: tpu7x:2x2x1
jax: 0.10.0
libtpu: 0.0.40
codegen_flags: <defaults>
</compile_context>

<pallas_src>
import functools

import jax
import jax.numpy as jnp
import numpy as np
from jax.experimental import pallas as pl
from jax.experimental.pallas import tpu as pltpu

ALPHA = 1.0
GAMMA = 2  # module default; integer 2 -> explicit square in the kernel


def _focal_loss_kernel(x_ref, t_ref, out_ref, *, n_rows, tile_m):
    i = pl.program_id(0)

    x = x_ref[...].astype(jnp.float32)                 # (TM, Cp) upcast-on-load
    tgt = t_ref[...]                                   # (TM, 1) int32 class ids

    # numerically-stable softmax pieces (row max / exp / sum-exp)
    m = jnp.max(x, axis=-1, keepdims=True)             # (TM, 1)
    e = jnp.exp(x - m)                                 # (TM, Cp) one EUP sweep
    sum_e = jnp.sum(e, axis=-1, keepdims=True)         # (TM, 1)

    # gather target logit via iota mask (replaces a one-hot input)
    col = jax.lax.broadcasted_iota(jnp.int32, x.shape, 1)        # (TM, Cp)
    tmask = col == tgt                                           # (TM, Cp) bool
    tgt_logit = jnp.sum(jnp.where(tmask, x, 0.0), axis=-1, keepdims=True)

    # per-row cross entropy and p_t (pt = exp(-ce): no e_tgt gather, no recip)
    ce = m + jnp.log(sum_e) - tgt_logit                # (TM, 1) = -log p_t
    pt = jnp.exp(-ce)                                  # (TM, 1) cheap EUP exp

    # focal weighting: gamma == 2 -> explicit square of clamped (1 - pt)
    one_minus_pt = jnp.maximum(1.0 - pt, 0.0)          # guard pt > 1 by a ULP
    fl = ALPHA * one_minus_pt * one_minus_pt * ce      # (TM, 1)

    # mask rows past the true N (padding of the last tile), emit partial sum
    row = jax.lax.broadcasted_iota(jnp.int32, (tile_m, 1), 0) + i * tile_m
    fl = jnp.where(row < n_rows, fl, 0.0)
    partial = jnp.sum(fl, axis=0, keepdims=True)       # (1, 1)
    out_ref[...] = jnp.broadcast_to(partial, (1, 128)) # lane-dense store


def focal_loss_pallas(inputs, targets, *, tile_m=None):
    """inputs: (N, C) f32/bf16 logits; targets: (N,) integer class indices."""
    n, c = inputs.shape

    # Pad the class axis to a multiple of 128 lanes with -inf so the kernel
    # never touches undefined padded lanes (exp(-inf)=0 keeps the math exact).
    c_pad = ((c + 127) // 128) * 128
    if c_pad != c:
        inputs = jnp.pad(inputs, ((0, 0), (0, c_pad - c)),
                         constant_values=float("-inf"))

    if tile_m is None:
        # Per-row working set (f32 worst case): 2x double-buffered logits
        # (8*Cp B) + one materialized exp tile (4*Cp B) + 2x target blocks
        # padded to 128 lanes (2*512 B).  Keep the total under ~32 MiB so the
        # kernel fits v7x's 64 MiB physical VMEM with headroom; target a
        # ~4 MiB logits buffer (well past the ~2 MiB / 85%-roofline knee).
        bytes_per_row = 12 * c_pad + 1024
        vmem_rows = (32 * 1024 * 1024) // bytes_per_row
        target_rows = (4 * 1024 * 1024) // (c_pad * 4)
        tile_m = max(8, (min(vmem_rows, target_rows, 8192) // 8) * 8)
        # Give both v7x TensorCores work (nt >= 2) once N is worth splitting.
        if n >= 2048:
            half = (((n + 1) // 2) + 7) // 8 * 8
            tile_m = min(tile_m, max(8, half))
    tile_m = min(tile_m, ((n + 7) // 8) * 8)           # stays a multiple of 8

    nt = pl.cdiv(n, tile_m)
    t2 = targets.astype(jnp.int32).reshape(n, 1)

    kernel = functools.partial(_focal_loss_kernel, n_rows=n, tile_m=tile_m)

    out = pl.pallas_call(
        kernel,
        out_shape=jax.ShapeDtypeStruct((1, nt * 128), jnp.float32),
        grid=(nt,),
        in_specs=[
            pl.BlockSpec((tile_m, c_pad), lambda i: (i, 0)),   # logits tile
            pl.BlockSpec((tile_m, 1), lambda i: (i, 0)),       # target ids tile
        ],
        out_specs=pl.BlockSpec((1, 128), lambda i: (0, i)),
        compiler_params=pltpu.CompilerParams(
            dimension_semantics=("parallel",),                 # dual-TC on v7x
            vmem_limit_bytes=48 * 1024 * 1024,                 # < 64 MiB (v7x)
        ),
    )(inputs, t2)

    partials = out.reshape(nt, 128)[:, 0]                      # one value / tile
    return jnp.sum(partials) / n


def _focal_loss_ref(inputs, targets):
    logp = jax.nn.log_softmax(inputs.astype(jnp.float32), axis=-1)
    ce = -jnp.take_along_axis(logp, targets[:, None], axis=-1)[:, 0]
    pt = jnp.exp(-ce)
    return jnp.mean(ALPHA * (1.0 - pt) ** GAMMA * ce)


if __name__ == "__main__":
    key = jax.random.PRNGKey(0)
    k_x, k_t = jax.random.split(key)

    # Test 1: N not a multiple of the tile -> exercises last-tile row masking.
    N, C = 56, 128
    x = jax.random.normal(k_x, (N, C), dtype=jnp.float32)
    t = jax.random.randint(k_t, (N,), 0, C, dtype=jnp.int32)
    loss = focal_loss_pallas(x, t, tile_m=16)       # 4 tiles, 8-row padded tail
    jax.block_until_ready(loss)
    ref = _focal_loss_ref(x, t)
    assert np.allclose(np.asarray(loss), np.asarray(ref),
                       rtol=1e-5, atol=1e-6), (loss, ref)

    # Test 2: C not a multiple of 128 -> exercises -inf lane padding and the
    # default (auto tile-size) heuristic path.
    N2, C2 = 40, 96
    k_x2, k_t2 = jax.random.split(k_t)
    x2 = jax.random.normal(k_x2, (N2, C2), dtype=jnp.float32)
    t2 = jax.random.randint(k_t2, (N2,), 0, C2, dtype=jnp.int32)
    loss2 = focal_loss_pallas(x2, t2)
    jax.block_until_ready(loss2)
    ref2 = _focal_loss_ref(x2, t2)
    assert np.allclose(np.asarray(loss2), np.asarray(ref2),
                       rtol=1e-5, atol=1e-6), (loss2, ref2)

    print("KERNEL_OK")
</pallas_src>

<mosaic_0001>
module attributes {stable_mosaic.version = 11 : i64} {
  func.func @_focal_loss_kernel(%arg0: i32, %arg1: memref<16x128xf32, #tpu.memory_space<vmem>>, %arg2: memref<16x1xi32, #tpu.memory_space<vmem>>, %arg3: memref<1x128xf32, #tpu.memory_space<vmem>>) attributes {dimension_semantics = [#tpu.dimension_semantics<parallel>], iteration_bounds = array<i64: 4>, scalar_prefetch = 0 : i64, scratch_operands = 0 : i64, tpu.core_type = #tpu.core_type<tc>, window_params = [{transform_indices = @transform_0, window_bounds = array<i64: 16, 128>}, {transform_indices = @transform_1, window_bounds = array<i64: 16, 1>}, {transform_indices = @transform_2, window_bounds = array<i64: 1, 128>}]} {
    %c0 = arith.constant 0 : index
    %c0_0 = arith.constant 0 : index
    %0 = vector.load %arg1[%c0, %c0_0] : memref<16x128xf32, #tpu.memory_space<vmem>>, vector<16x128xf32>
    %c0_1 = arith.constant 0 : index
    %c0_2 = arith.constant 0 : index
    %1 = vector.load %arg2[%c0_1, %c0_2] : memref<16x1xi32, #tpu.memory_space<vmem>>, vector<16x1xi32>
    %cst = arith.constant dense<0xFF800000> : vector<16xf32>
    %2 = vector.multi_reduction <maximumf>, %0, %cst [1] : vector<16x128xf32> to vector<16xf32>
    %3 = vector.shape_cast %2 : vector<16xf32> to vector<16x1xf32>
    %4 = vector.broadcast %3 : vector<16x1xf32> to vector<16x128xf32>
    %5 = arith.subf %0, %4 : vector<16x128xf32>
    %6 = math.exp %5 : vector<16x128xf32>
    %cst_3 = arith.constant dense<0.000000e+00> : vector<16xf32>
    %7 = vector.multi_reduction <add>, %6, %cst_3 [1] : vector<16x128xf32> to vector<16xf32>
    %8 = vector.shape_cast %7 : vector<16xf32> to vector<16x1xf32>
    %9 = tpu.iota {dimensions = array<i32: 1>} : vector<16x128xi32>
    %10 = vector.broadcast %1 : vector<16x1xi32> to vector<16x128xi32>
    %11 = arith.cmpi eq, %9, %10 : vector<16x128xi32>
    %cst_4 = arith.constant 0.000000e+00 : f32
    %12 = vector.broadcast %cst_4 : f32 to vector<16x128xf32>
    %13 = arith.select %11, %0, %12 : vector<16x128xi1>, vector<16x128xf32>
    %cst_5 = arith.constant dense<0.000000e+00> : vector<16xf32>
    %14 = vector.multi_reduction <add>, %13, %cst_5 [1] : vector<16x128xf32> to vector<16xf32>
    %15 = vector.shape_cast %14 : vector<16xf32> to vector<16x1xf32>
    %16 = math.log %8 : vector<16x1xf32>
    %17 = arith.addf %3, %16 : vector<16x1xf32>
    %18 = arith.subf %17, %15 : vector<16x1xf32>
    %cst_6 = arith.constant 0.000000e+00 : f32
    %19 = vector.broadcast %cst_6 : f32 to vector<16x1xf32>
    %20 = arith.subf %19, %18 : vector<16x1xf32>
    %21 = math.exp %20 : vector<16x1xf32>
    %cst_7 = arith.constant 1.000000e+00 : f32
    %22 = vector.broadcast %cst_7 : f32 to vector<16x1xf32>
    %23 = arith.subf %22, %21 : vector<16x1xf32>
    %cst_8 = arith.constant 0.000000e+00 : f32
    %24 = vector.broadcast %cst_8 : f32 to vector<16x1xf32>
    %25 = arith.maximumf %23, %24 : vector<16x1xf32>
    %cst_9 = arith.constant 1.000000e+00 : f32
    %26 = vector.broadcast %cst_9 : f32 to vector<16x1xf32>
    %27 = arith.mulf %26, %25 : vector<16x1xf32>
    %28 = arith.mulf %27, %25 : vector<16x1xf32>
    %29 = arith.mulf %28, %18 : vector<16x1xf32>
    %30 = tpu.iota {dimensions = array<i32: 0>} : vector<16x1xi32>
    %c16_i32 = arith.constant 16 : i32
    %31 = arith.muli %arg0, %c16_i32 : i32
    %32 = vector.broadcast %31 : i32 to vector<16x1xi32>
    %33 = arith.addi %30, %32 : vector<16x1xi32>
    %c56_i32 = arith.constant 56 : i32
    %34 = vector.broadcast %c56_i32 : i32 to vector<16x1xi32>
    %35 = arith.cmpi slt, %33, %34 : vector<16x1xi32>
    %cst_10 = arith.constant 0.000000e+00 : f32
    %36 = vector.broadcast %cst_10 : f32 to vector<16x1xf32>
    %37 = arith.select %35, %29, %36 : vector<16x1xi1>, vector<16x1xf32>
    %cst_11 = arith.constant dense<0.000000e+00> : vector<1xf32>
    %38 = vector.multi_reduction <add>, %37, %cst_11 [0] : vector<16x1xf32> to vector<1xf32>
    %39 = vector.shape_cast %38 : vector<1xf32> to vector<1x1xf32>
    %40 = vector.shape_cast %39 : vector<1x1xf32> to vector<1x1xf32>
    %41 = vector.broadcast %40 : vector<1x1xf32> to vector<1x128xf32>
    %c0_12 = arith.constant 0 : index
    %c0_13 = arith.constant 0 : index
    %42 = vector.load %arg3[%c0_12, %c0_13] : memref<1x128xf32, #tpu.memory_space<vmem>>, vector<1x128xf32>
    tpu.vector_store %arg3[%c0_12, %c0_13], %41 {strides = array<i32>} : memref<1x128xf32, #tpu.memory_space<vmem>>, vector<1x128xf32>,
    return
  }
  func.func @transform_0(%arg0: i32) -> (i32, i32) {
    %c0_i32 = arith.constant 0 : i32
    %c0_i32_0 = arith.constant 0 : i32
    return %arg0, %c0_i32 : i32, i32
  }
  func.func @transform_1(%arg0: i32) -> (i32, i32) {
    %c0_i32 = arith.constant 0 : i32
    %c0_i32_0 = arith.constant 0 : i32
    return %arg0, %c0_i32 : i32, i32
  }
  func.func @transform_2(%arg0: i32) -> (i32, i32) {
    %c0_i32 = arith.constant 0 : i32
    %c0_i32_0 = arith.constant 0 : i32
    return %c0_i32, %arg0 : i32, i32
  }
}

</mosaic_0001>

<bundles_post_ra>
// kernel: tpu_custom_call.1
= control target key start
LH: loop header
LB: loop body
LE: loop exit
PB: predicated region body
PF: predicated region fallthrough
CT: control target
= control target key end

     0   :  { %7 = vsyncpa [#allocation3], 0  ;;  %s609_s0 = inlined_call_operand.vmem [shape: f32[56,128], index: 0, kind: input, shape index: {}]   ;;  %s610_s1 = inlined_call_operand.vmem [shape: s32[56,1], index: 1, kind: input, shape index: {}]   ;;  %s611_s2 = inlined_call_operand.hbm [shape: f32[1,512], index: 2, kind: output, shape index: {}]  }
   0x1   :  { %9 = vsyncpa [#allocation3 + $0x1], 0  ;;  %s507_s9 = smov 0   ;;  %s509_s10 = smov 0  }
   0x2   :  { %s511_s11 = smov 0   ;;  %s513_s12 = smov 0  }
   0x3 LB: > { %s528_s13 = sadd.s32 4294967295, %s488_s12   ;;  %s360_s14 = sadd.s32 4294967294, %s488_s12   ;;  %s488_s12 = sphi %s513_s12, %s617_s12   ;;  %s484_s11 = sphi %s511_s11, %s616_s11   ;;  %s480_s10 = sphi %s509_s10, %s615_s10   ;;  %s476_s9 = sphi %s507_s9, %s614_s9  }
   0x4   : > { %s532_s15 = sadd.s32 1, %s488_s12   ;;  %s74_s16 = sadd.s32 1, %s484_s11 }
   0x5   : > { %s71_s17 = ssub.s32 %s488_s12, %s532_s15  ;;  %p84_p0 = scmp.ne.s32.totalorder %s484_s11, %s480_s10 }
   0x6   : > { %p72_p1 = scmp.eq.s32.totalorder %s71_s17, 0  ;;  %p85_p2 = scmp.eq.s32.totalorder %s528_s13, 3 }
   0x7   : > { %p90_p3 = scmp.ne.s32.totalorder %s480_s10, %s476_s9  ;;  %p91_p4 = scmp.eq.s32.totalorder %s360_s14, 3 }
   0x8   : > { %s543_s18 = scalar_select %p72_p1, %s484_s11, %s74_s16  }
   0x9   : > { %p545_p5 = por %p85_p2, %p84_p0  ;;  %p549_p6 = por %p91_p4, %p90_p3 }
   0xa   : > { %p363_p7 = scmp.ge.s32.totalorder %s488_s12, 1  ;;  %p143_p8 = scmp.lt.s32.totalorder %s488_s12, 5 }
   0xc   : > { %p144_p9 = pnand %p363_p7, %p143_p8 }
   0xd   : > { %s364_s21 = sshll.u32 (!%p144_p9), %s528_s13, 1  ;;  %v490_v0 = vmov (!%p144_p9), 0   ;;  %v223_v10 = vlaneseq (!%p144_p9)  ;;  %s368_s29 = sshll.u32 (!%p144_p9), %s528_s13, 4 }
   0xe   : > { %147 = sbr.rel (%p144_p9) target bundleno = 397 (0x18d), region = 28  ;;  %p182_p10 = scmp.lt.s32.totalorder (!%p144_p9), %s364_s21, 6  ;;  %412 = vset.pattern.permute.xlu1 (!%p144_p9), %v490_v0  ;;  %413 = vset.pattern.permute.xlu0 (!%p144_p9), %v490_v0  ;;  %v265_v39 = vstv (!%p144_p9), %s368_s29 }
   0xf   : > { %v224_v13 = vand.u32 (!%p144_p9), 127, %v223_v10  ;;  %v262_v36 = vshrl.u32 (!%p144_p9), %v223_v10, 7  ;;  %s175_s30 = sand.u32 (!%p144_p9), 1, %s480_s10   ;;  %s567_s7 = scalar_lea.hbm (!%p144_p9), %s611_s2, %s368_s29 }
  0x10   : > { %s176_s3 = scalar_lea.vmem (!%p144_p9), [#allocation2], %s175_s30  ;;  %s281_s8 = scalar_lea.sflag (!%p144_p9), [#allocation3], %s175_s30 }
  0x11   : > { %v263_v38 = vadd.s32 (!%p144_p9), 8, %v262_v36  ;;  %v266_v44 = vadd.s32 (!%p144_p9), %v265_v39, %v262_v36  ;;  %s293_s4 = sshll.u32 (!%p144_p9), %s176_s3, 4  ;;  %s491_s14 = smov (!%p144_p9), [#allocation2]   ;;  %s569_s4 = int_to_ptr.vmem [resolvable:$true] %s293_s4 }
  0x12   : > { %s426_s13 = scalar_lea.vmem (!%p144_p9), %s569_s4, 16  ;;  %s430_s16 = sshll.u32 (!%p144_p9), %s491_s14, 4  ;;  %s431_s16 = int_to_ptr.vmem [resolvable:$false] %s430_s16 }
  0x13   : > { %v267_v45 = vadd.s32 (!%p144_p9), %v265_v39, %v263_v38  ;;  %vm268_vm2 = vcmp.lt.s32.totalorder (!%p144_p9), %v266_v44, 56  ;;  %p427_p11 = scmp.ne.s32.totalorder (!%p144_p9), %s569_s4, %s426_s13  ;;  %s432_s17 = scalar_lea.vmem (!%p144_p9), %s431_s16, 32 }
  0x14   : > { %p433_p0 = scmp.lt.s32.totalorder (!%p144_p9), %s569_s4, %s431_s16  ;;  %p434_p1 = scmp.lt.s32.totalorder (!%p144_p9), %s432_s17, %s426_s13 }
  0x15   : > { %s619_s21 = smov (!%p182_p10, %s364_s21), 6  ;;  %vm269_vm3 = vcmp.lt.s32.totalorder %v267_v45, 56  ;;  %p428_p12 = pnand %p427_p11, %p545_p5 }
  0x16   : > { %s365_s22 = sshll.u32 %s619_s21, 3  ;;  %p435_p2 = por %p434_p1, %p433_p0 }
  0x17   : > { %s185_s25 = scalar_lea.vmem %s609_s0, %s365_s22  ;;  %s199_s28 = scalar_lea.vmem %s610_s1, %s365_s22 }
  0x18   : > { %v205_v1 = vld [vmem:[%s185_s25] sm:$0xff]  ;;  %v206_v3 = vld [vmem:[%s185_s25 + $0x8] sm:$0xff]  ;;  %p429_p13 = pneg %p428_p12 }
  0x19   : > { %v207_v2 = vld [vmem:[%s199_s28] sm:$0xff]  ;;  %209 = vmax.xlane.f32.xlu0 %v205_v1  ;;  %v208_v4 = vld [vmem:[%s199_s28 + $0x8] sm:$0xff] }
  0x1a   : > { %226 = vperm.xlu1 %412, %v207_v2   ;;  %p436_p3 = pnand %p435_p2, %p429_p13 }
  0x1d   : > { %211 = vmax.xlane.f32.xlu0 %v206_v3 }
  0x1e   : > { %229 = vperm.xlu1 %412, %v208_v4  }
  0x99   : > { %v227_v12 = vpop.permute.xlu1 %226 }
  0x9a   : > { %vm231_vm0 = vcmp.eq.s32.totalorder %v224_v13, %v227_v12 }
  0x9b   : > { %v233_v16 = vsel %vm231_vm0, %v205_v1, 0.0 }
  0x9d   : > { %v230_v15 = vpop.permute.xlu1 %229 }
  0x9e   : > { %vm232_vm1 = vcmp.eq.s32.totalorder %v224_v13, %v230_v15 }
  0x9f   : > { %v234_v18 = vsel %vm232_vm1, %v206_v3, 0.0 }
  0xa6   : > { %v210_v5 = vpop.xlane.xlu0 %209 }
  0xa7   : > { %v213_v6 = vsub.f32 %v205_v1, %v210_v5 }
  0xa9   : > { %v215_v7 = vmul.f32 1.442695, %v213_v6 }
  0xaa   : > { %v212_v8 = vpop.xlane.xlu0 %211 }
  0xab   : > { %414 = vpow2.f32 %v215_v7  ;;  %v214_v9 = vsub.f32 %v206_v3, %v212_v8 }
  0xad   : > { %v217_v11 = vmul.f32 1.442695, %v214_v9 }
  0xaf   : > { %416 = vpow2.f32 %v217_v11 }
  0xb5   : > { %v415_v14 = vpop.eup %414 }
  0xb6   : > { %219 = vadd.xlane.f32.xlu0 %v415_v14 }
  0xb9   : > { %v417_v17 = vpop.eup %416 }
  0xba   : > { %221 = vadd.xlane.f32.xlu1 %v417_v17  ;;  %235 = vadd.xlane.f32.xlu0 %v233_v16 }
  0xbe   : > { %237 = vadd.xlane.f32.xlu0 %v234_v18 }
 0x143   : > { %v220_v19 = vpop.xlane.xlu0 %219 }
 0x144   : > { %418 = vlog2.f32 %v220_v19 }
 0x147   : > { %v222_v20 = vpop.xlane.xlu1 %221  ;;  %v236_v23 = vpop.xlane.xlu0 %235 }
 0x148   : > { %420 = vlog2.f32 %v222_v20 }
 0x14b   : > { %v238_v30 = vpop.xlane.xlu0 %237 }
 0x14e   : > { %v419_v21 = vpop.eup %418 }
 0x14f   : > { %v240_v22 = vmul.f32 0.6931472, %v419_v21 }
 0x151   : > { %v243_v24 = vadd.f32 %v240_v22, %v210_v5 }
 0x152   : > { %v421_v25 = vpop.eup %420 }
 0x153   : > { %v242_v26 = vmul.f32 0.6931472, %v421_v25  ;;  %v245_v27 = vsub.f32 %v243_v24, %v236_v23 }
 0x155   : > { %v247_v28 = vsub.f32 0.0, %v245_v27  ;;  %v244_v29 = vadd.f32 %v242_v26, %v212_v8 }
 0x157   : > { %v249_v31 = vmul.f32 1.442695, %v247_v28  ;;  %v246_v32 = vsub.f32 %v244_v29, %v238_v30 }
 0x159   : > { %422 = vpow2.f32 %v249_v31  ;;  %v248_v33 = vsub.f32 0.0, %v246_v32 }
 0x15b   : > { %v251_v34 = vmul.f32 1.442695, %v248_v33 }
 0x15d   : > { %424 = vpow2.f32 %v251_v34 }
 0x163   : > { %v423_v35 = vpop.eup %422 }
 0x164   : > { %v253_v37 = vsub.f32 1.0, %v423_v35 }
 0x166   : > { %v255_v40 = vmax.f32 %v253_v37, 0.0 }
 0x167   : > { %v425_v41 = vpop.eup %424 }
 0x168   : > { %v257_v42 = vmul.f32 %v255_v40, %v255_v40  ;;  %v254_v43 = vsub.f32 1.0, %v425_v41 }
 0x16a   : > { %v256_v46 = vmax.f32 %v254_v43, 0.0  ;;  %v259_v47 = vmul.f32 %v257_v42, %v245_v27 }
 0x16c   : > { %v258_v48 = vmul.f32 %v256_v46, %v256_v46  ;;  %v270_v50 = vsel %vm268_vm2, %v259_v47, 0.0 }
 0x16e   : > { %v260_v49 = vmul.f32 %v258_v48, %v246_v32 }
 0x170   : > { %v271_v51 = vsel %vm269_vm3, %v260_v49, 0.0 }
 0x171   : > { %v272_v52 = vadd.f32 %v271_v51, %v270_v50 }
 0x173   : > { %v273_v53 = vrot.slane %v272_v52, 4 }
 0x175   : > { %v274_v54 = vadd.f32 %v273_v53, %v272_v52 }
 0x177   : > { %v275_v55 = vrot.slane %v274_v54, 2 }
 0x179   : > { %v276_v56 = vadd.f32 %v275_v55, %v274_v54 }
 0x17b   : > { %v277_v57 = vrot.slane %v276_v56, 1 }
 0x17d   : > { %v278_v58 = vadd.f32 %v277_v57, %v276_v56 }
 0x17f   : > { %279 = vst [vmem:[%s176_s3] sm:$0x1] %v278_v58 }
 0x180   : > { %439 = shalt.err (!%p436_p3)
}
 0x181   : > { %s440_s21 = scalar_lea.hbm %s567_s7, 16  ;;  %s444_s24 = scalar_lea.hbm %s611_s2, 64 }
 0x182   : > { %p441_p4 = scmp.ne.s32.totalorder %s567_s7, %s440_s21  ;;  %p445_p9 = scmp.lt.u32.totalorder %s567_s7, %s611_s2 }
 0x183   : > { %p446_p10 = scmp.lt.u32.totalorder %s444_s24, %s440_s21  ;;  %p448_p12 = scmp.lt.u32.totalorder %s440_s21, %s567_s7 }
 0x184   : > { %p442_p7 = pnand %p441_p4, %p545_p5 }
 0x185   : > { %p447_p11 = por %p446_p10, %p445_p9 }
 0x186   : > { %p443_p8 = pneg %p442_p7 }
 0x187   : > { %p449_p13 = por %p448_p12, %p447_p11 }
 0x189   : > { %p450_p0 = pnand %p449_p13, %p443_p8 }
 0x18b   : > { %453 = shalt.err (!%p450_p0)
}
 0x18c   : > { %372 = dma.vmem_to_hbm [thread:$0]  (%p545_p5), %s569_s4, 16, %s567_s7, %s281_s8  }
 0x18d PF: > { %p378_p1 = scmp.ge.s32.totalorder %s488_s12, 2  ;;  %s305_s27 = sand.u32 1, %s476_s9  }
 0x18e   : > { %s306_s28 = scalar_lea.sflag [#allocation3], %s305_s27 }
 0x18f   : > { %p375_p2 = pnand %p378_p1, %p549_p6 }
 0x191   : > { %471 = dma.done.wait (!%p375_p2), %s306_s28, 16  }
 0x192   : > { %473 = vsyncadd (!%p375_p2), %s306_s28, 4294967280  ;;  %p12_p3 = scmp.ge.s32.totalorder %s532_s15, 6   ;;  %s614_s9 = smov %s480_s10 }
 0x193   : > { %s615_s10 = smov %s484_s11  ;;  %s616_s11 = smov %s543_s18 }
 0x194   : > { %s617_s12 = smov %s532_s15  ;;  %14 = sbr.rel (!%p12_p3) target bundleno = 3 (0x3), region = 66 }
 0x19b   :  { %310 = vsyncpa [#allocation3], 1 }
 0x19c   :  { %312 = vsyncpa [#allocation3 + $0x1], 1 }

</bundles_post_ra>
